<compile_context>
chip_gen: v7x
topology: tpu7x:2x2x1
jax: 0.10.0
libtpu: 0.0.40
codegen_flags: <defaults>
</compile_context>

<pallas_src>
import jax
import jax.numpy as jnp
from jax import lax
from jax.experimental import pallas as pl
from jax.experimental.pallas import tpu as pltpu

LAMBDA_CE = 5.0  # BiRefNet Config().lambdas_cls['ce']


def _make_cls_loss_kernel(scale):
    """scale = LAMBDA_CE / B  (per-level batch-mean, summed over levels)."""

    def kernel(labels_ref, logits_ref, out_ref):
        # labels_ref: VMEM i32 (N*B, 1)
        # logits_ref: VMEM f32 (N*B, C)
        # out_ref:    SMEM f32 (1, 1)
        logits = logits_ref[...]                     # (NB, C)
        labels = labels_ref[...]                     # (NB, 1)
        nb, c = logits.shape

        # One-hot selection of the true-class logit (no gather on TPU):
        # compare a lane iota against the per-row label (sublane broadcast).
        col_ids = lax.broadcasted_iota(jnp.int32, (nb, c), 1)
        onehot = col_ids == labels                   # (NB, C)

        # Numerically stable log-softmax NLL, sharing the max-shifted logits
        # between the exp-sum and the picked-logit terms.
        m = jnp.max(logits, axis=-1, keepdims=True)                    # (NB, 1)
        shifted = logits - m                                           # (NB, C)
        log_z = jnp.log(jnp.sum(jnp.exp(shifted), axis=-1,
                                keepdims=True))                        # (NB, 1)
        picked = jnp.where(onehot, shifted, 0.0)                       # (NB, C)

        # sum_rows nll = sum_rows log_z - sum_all picked ; single scalar store.
        out_ref[0, 0] = (jnp.sum(log_z) - jnp.sum(picked)) * jnp.float32(scale)

    return kernel


def cls_loss(preds, gt):
    """preds: f32 [N, B, C] stacked logits (or list of [B, C]); gt: int [B].

    Returns scalar f32 loss = sum_n CE_mean(preds[n], gt) * 5.0
    """
    if isinstance(preds, (list, tuple)):
        preds = jnp.stack([p for p in preds if p is not None], axis=0)
    n_lvls, b, c = preds.shape
    nb = n_lvls * b

    # Fold levels into the batch/sublane axis: one dense 2-D tile.
    logits2d = preds.astype(jnp.float32).reshape(nb, c)
    labels = jnp.tile(gt.astype(jnp.int32), n_lvls).reshape(nb, 1)

    kernel = _make_cls_loss_kernel(LAMBDA_CE / float(b))

    out = pl.pallas_call(
        kernel,
        out_shape=jax.ShapeDtypeStruct((1, 1), jnp.float32),
        grid=(1,),  # single step: whole problem fits trivially in VMEM
        in_specs=[
            pl.BlockSpec((nb, 1), lambda i: (0, 0)),   # labels, resident
            pl.BlockSpec((nb, c), lambda i: (0, 0)),   # all levels at once
        ],
        out_specs=pl.BlockSpec((1, 1), lambda i: (0, 0),
                               memory_space=pltpu.SMEM),
        compiler_params=pltpu.CompilerParams(
            dimension_semantics=("arbitrary",),
        ),
        cost_estimate=pl.CostEstimate(
            flops=6 * nb * c,
            transcendentals=nb * c + nb,          # exp per element + log per row
            bytes_accessed=(nb * c + nb + 1) * 4,
        ),
    )(labels, logits2d)
    return out[0, 0]


def _reference_cls_loss(preds_stacked, gt):
    """Pure-JAX reference mirroring PyTorch nn.CrossEntropyLoss (mean)."""
    logp = jax.nn.log_softmax(preds_stacked, axis=-1)                      # (N, B, C)
    nll = -jnp.take_along_axis(logp, gt[None, :, None], axis=-1)[..., 0]   # (N, B)
    return jnp.sum(jnp.mean(nll, axis=-1)) * LAMBDA_CE


if __name__ == "__main__":
    key = jax.random.PRNGKey(0)
    k1, k2 = jax.random.split(key)

    N_LEVELS, B, C = 3, 8, 16   # 3 refined class outputs, batch 8, 16 classes
    preds = jax.random.normal(k1, (N_LEVELS, B, C), dtype=jnp.float32)
    gt = jax.random.randint(k2, (B,), 0, C, dtype=jnp.int32)

    loss = jax.block_until_ready(cls_loss(preds, gt))
    ref = jax.block_until_ready(_reference_cls_loss(preds, gt))

    assert jnp.allclose(loss, ref, rtol=1e-5, atol=1e-5), (loss, ref)
    print("KERNEL_OK")
</pallas_src>

<mosaic_0001>
module attributes {stable_mosaic.version = 11 : i64} {
  func.func @kernel(%arg0: i32, %arg1: memref<24x1xi32, #tpu.memory_space<vmem>>, %arg2: memref<24x16xf32, #tpu.memory_space<vmem>>, %arg3: memref<1x1xf32, #tpu.memory_space<smem>>) attributes {dimension_semantics = [#tpu.dimension_semantics<arbitrary>], iteration_bounds = array<i64: 1>, scalar_prefetch = 0 : i64, scratch_operands = 0 : i64, tpu.core_type = #tpu.core_type<tc>, window_params = [{pipeline_mode = #tpu.pipeline_mode<synchronous>, transform_indices = @transform_0, window_bounds = array<i64: 24, 1>}, {pipeline_mode = #tpu.pipeline_mode<synchronous>, transform_indices = @transform_1, window_bounds = array<i64: 24, 16>}, {transform_indices = @transform_2, window_bounds = array<i64: 1, 1>}]} {
    %c0 = arith.constant 0 : index
    %c0_0 = arith.constant 0 : index
    %0 = vector.load %arg2[%c0, %c0_0] : memref<24x16xf32, #tpu.memory_space<vmem>>, vector<24x16xf32>
    %c0_1 = arith.constant 0 : index
    %c0_2 = arith.constant 0 : index
    %1 = vector.load %arg1[%c0_1, %c0_2] : memref<24x1xi32, #tpu.memory_space<vmem>>, vector<24x1xi32>
    %2 = tpu.iota {dimensions = array<i32: 1>} : vector<24x16xi32>
    %3 = vector.broadcast %1 : vector<24x1xi32> to vector<24x16xi32>
    %4 = arith.cmpi eq, %2, %3 : vector<24x16xi32>
    %cst = arith.constant dense<0xFF800000> : vector<24xf32>
    %5 = vector.multi_reduction <maximumf>, %0, %cst [1] : vector<24x16xf32> to vector<24xf32>
    %6 = vector.shape_cast %5 : vector<24xf32> to vector<24x1xf32>
    %7 = vector.broadcast %6 : vector<24x1xf32> to vector<24x16xf32>
    %8 = arith.subf %0, %7 : vector<24x16xf32>
    %9 = math.exp %8 : vector<24x16xf32>
    %cst_3 = arith.constant dense<0.000000e+00> : vector<24xf32>
    %10 = vector.multi_reduction <add>, %9, %cst_3 [1] : vector<24x16xf32> to vector<24xf32>
    %11 = vector.shape_cast %10 : vector<24xf32> to vector<24x1xf32>
    %12 = math.log %11 : vector<24x1xf32>
    %cst_4 = arith.constant 0.000000e+00 : f32
    %13 = vector.broadcast %cst_4 : f32 to vector<24x16xf32>
    %14 = arith.select %4, %8, %13 : vector<24x16xi1>, vector<24x16xf32>
    %15 = vector.shape_cast %12 : vector<24x1xf32> to vector<1x24x1xf32>
    %cst_5 = arith.constant dense<0.000000e+00> : vector<1xf32>
    %16 = vector.multi_reduction <add>, %15, %cst_5 [1, 2] : vector<1x24x1xf32> to vector<1xf32>
    %17 = vector.shape_cast %16 : vector<1xf32> to vector<1x1x1xf32>
    %18 = vector.extract %17[0, 0, 0] : f32 from vector<1x1x1xf32>
    %19 = vector.shape_cast %14 : vector<24x16xf32> to vector<1x24x16xf32>
    %cst_6 = arith.constant dense<0.000000e+00> : vector<1xf32>
    %20 = vector.multi_reduction <add>, %19, %cst_6 [1, 2] : vector<1x24x16xf32> to vector<1xf32>
    %21 = vector.shape_cast %20 : vector<1xf32> to vector<1x1x1xf32>
    %22 = vector.extract %21[0, 0, 0] : f32 from vector<1x1x1xf32>
    %23 = arith.subf %18, %22 : f32
    %cst_7 = arith.constant 6.250000e-01 : f32
    %24 = arith.mulf %23, %cst_7 : f32
    %c0_8 = arith.constant 0 : index
    %c0_9 = arith.constant 0 : index
    %25 = memref.load %arg3[%c0_8, %c0_9] : memref<1x1xf32, #tpu.memory_space<smem>>
    memref.store %24, %arg3[%c0_8, %c0_9] : memref<1x1xf32, #tpu.memory_space<smem>>
    return
  }
  func.func @transform_0(%arg0: i32) -> (i32, i32) {
    %c0_i32 = arith.constant 0 : i32
    %c0_i32_0 = arith.constant 0 : i32
    %c0_i32_1 = arith.constant 0 : i32
    return %c0_i32, %c0_i32_0 : i32, i32
  }
  func.func @transform_1(%arg0: i32) -> (i32, i32) {
    %c0_i32 = arith.constant 0 : i32
    %c0_i32_0 = arith.constant 0 : i32
    %c0_i32_1 = arith.constant 0 : i32
    return %c0_i32, %c0_i32_0 : i32, i32
  }
  func.func @transform_2(%arg0: i32) -> (i32, i32) {
    %c0_i32 = arith.constant 0 : i32
    %c0_i32_0 = arith.constant 0 : i32
    %c0_i32_1 = arith.constant 0 : i32
    return %c0_i32, %c0_i32_0 : i32, i32
  }
}

</mosaic_0001>

<bundles_post_ra>
// kernel: tpu_custom_call.1
= control target key start
LH: loop header
LB: loop body
LE: loop exit
PB: predicated region body
PF: predicated region fallthrough
CT: control target
= control target key end

     0   :  { %vm32_vm0 = vcmask 130048   ;;  %s203_s0 = inlined_call_operand.vmem [shape: s32[24,1], index: 0, kind: input, shape index: {}]   ;;  %s204_s1 = inlined_call_operand.vmem [shape: f32[24,16], index: 1, kind: input, shape index: {}]   ;;  %s205_s2 = inlined_call_operand.hbm [shape: f32[1,1], index: 2, kind: output, shape index: {}]  }
   0x1   :  { %v12_v0 = vld [vmem:[%s204_s1] sm:$0xff]  ;;  %v13_v1 = vld [vmem:[%s204_s1 + $0x8] sm:$0xff]  ;;  %v14_v2 = vld [vmem:[%s204_s1 + $0x10] sm:$0xff] }
   0x2   :  { %v33_v3 = vsel %vm32_vm0, %v12_v0, -inf  ;;  %v39_v4 = vsel %vm32_vm0, %v14_v2, -inf }
   0x3   :  { %7 = vsyncpa [#allocation3], 0  ;;  %34 = vmax.xlane.f32.xlu0 %v33_v3  ;;  %40 = vmax.xlane.f32.xlu1 %v39_v4  ;;  %v36_v5 = vsel %vm32_vm0, %v13_v1, -inf  ;;  %v147_v6 = vmov 0   ;;  %v16_v17 = vld [vmem:[%s203_s0 + $0x8] sm:$0xff]  ;;  %v15_v18 = vld [vmem:[%s203_s0] sm:$0xff]  ;;  %v18_v27 = vlaneseq }
   0x4   :  { %122 = vset.pattern.permute.xlu1 %v147_v6  ;;  %121 = vset.pattern.permute.xlu0 %v147_v6  ;;  %v17_v24 = vld [vmem:[%s203_s0 + $0x10] sm:$0xff]  ;;  %vm69_vm4 = vcmask 7168   ;;  %s135_s25 = scalar_lea.hbm %s205_s2, 16 }
   0x5   :  { %v19_v29 = vand.u32 127, %v18_v27  ;;  %p136_p0 = scmp.ne.s32.totalorder %s205_s2, %s135_s25  ;;  %p139_p1 = scmp.lt.u32.totalorder %s135_s25, %s205_s2 }
   0x7   :  { %37 = vmax.xlane.f32.xlu0 %v36_v5  ;;  %p141_p2 = pnand %p139_p1, %p136_p0 }
  0x90   :  { %v35_v7 = vpop.xlane.xlu0 %34  ;;  %v41_v19 = vpop.xlane.xlu1 %40 }
  0x91   :  { %v42_v8 = vsub.f32 %v12_v0, %v35_v7  ;;  %v44_v20 = vsub.f32 %v14_v2, %v41_v19 }
  0x93   :  { %v45_v9 = vmul.f32 1.442695, %v42_v8  ;;  %v49_v21 = vmul.f32 1.442695, %v44_v20 }
  0x94   :  { %v38_v10 = vpop.xlane.xlu0 %37 }
  0x95   :  { %123 = vpow2.f32 %v45_v9  ;;  %v43_v11 = vsub.f32 %v13_v1, %v38_v10 }
  0x97   :  { %v47_v12 = vmul.f32 1.442695, %v43_v11 }
  0x99   :  { %125 = vpow2.f32 %v47_v12 }
  0x9a   :  { %127 = vpow2.f32 %v49_v21 }
  0x9f   :  { %v124_v13 = vpop.eup %123 }
  0xa0   :  { %v51_v14 = vsel %vm32_vm0, %v124_v13, 0.0 }
  0xa1   :  { %52 = vadd.xlane.f32.xlu1 %v51_v14 }
  0xa3   :  { %v126_v15 = vpop.eup %125 }
  0xa4   :  { %v54_v16 = vsel %vm32_vm0, %v126_v15, 0.0  ;;  %v128_v22 = vpop.eup %127 }
  0xa5   :  { %55 = vadd.xlane.f32.xlu0 %v54_v16  ;;  %v57_v23 = vsel %vm32_vm0, %v128_v22, 0.0 }
  0xb2   :  { %24 = vperm.xlu1 %122, %v16_v17  }
  0xbb   :  { %21 = vperm.xlu0 %121, %v15_v18  }
  0xd6   :  { %58 = vadd.xlane.f32.xlu1 %v57_v23 }
  0xe7   :  { %27 = vperm.xlu1 %122, %v17_v24  }
 0x12e   :  { %v53_v25 = vpop.xlane.xlu1 %52 }
 0x132   :  { %v56_v26 = vpop.xlane.xlu0 %55  ;;  %v25_v30 = vpop.permute.xlu1 %24 }
 0x133   :  { %129 = vlog2.f32 %v56_v26  ;;  %vm30_vm2 = vcmp.eq.s32.totalorder %v19_v29, %v25_v30 }
 0x134   :  { %131 = vlog2.f32 %v53_v25  ;;  %v67_v33 = vsel %vm30_vm2, %v43_v11, 0.0 }
 0x135   :  { %v85_v38 = vsel %vm32_vm0, %v67_v33, 0.0 }
 0x13a   :  { %v22_v28 = vpop.permute.xlu0 %21 }
 0x13b   :  { %vm29_vm1 = vcmp.eq.s32.totalorder %v19_v29, %v22_v28 }
 0x13c   :  { %v66_v31 = vsel %vm29_vm1, %v42_v8, 0.0 }
 0x13d   :  { %v130_v34 = vpop.eup %129  ;;  %v84_v35 = vsel %vm32_vm0, %v66_v31, 0.0 }
 0x13e   :  { %v132_v37 = vpop.eup %131  ;;  %v63_v39 = vmul.f32 0.6931472, %v130_v34  ;;  %v86_v41 = vadd.f32 %v85_v38, %v84_v35 }
 0x13f   :  { %v61_v43 = vmul.f32 0.6931472, %v132_v37 }
 0x140   :  { %v71_v45 = vsel %vm69_vm4, %v63_v39, 0.0 }
 0x141   :  { %v70_v48 = vsel %vm69_vm4, %v61_v43, 0.0 }
 0x142   :  { %v72_v49 = vadd.f32 %v71_v45, %v70_v48 }
 0x163   :  { %v59_v32 = vpop.xlane.xlu1 %58 }
 0x164   :  { %133 = vlog2.f32 %v59_v32 }
 0x167   :  { %v28_v36 = vpop.permute.xlu1 %27 }
 0x168   :  { %vm31_vm3 = vcmp.eq.s32.totalorder %v19_v29, %v28_v36 }
 0x169   :  { %v68_v40 = vsel %vm31_vm3, %v44_v20, 0.0 }
 0x16a   :  { %v87_v42 = vsel %vm32_vm0, %v68_v40, 0.0 }
 0x16b   :  { %v88_v44 = vadd.f32 %v87_v42, %v86_v41 }
 0x16d   :  { %89 = vadd.xlane.f32.xlu0 %v88_v44 }
 0x16e   :  { %v134_v46 = vpop.eup %133 }
 0x16f   :  { %v65_v47 = vmul.f32 0.6931472, %v134_v46 }
 0x171   :  { %v73_v50 = vsel %vm69_vm4, %v65_v47, 0.0 }
 0x172   :  { %v74_v51 = vadd.f32 %v73_v50, %v72_v49 }
 0x174   :  { %75 = vadd.xlane.f32.xlu1 %v74_v51 }
 0x1fa   :  { %v90_v52 = vpop.xlane.xlu0 %89 }
 0x1fb   :  { %v91_v53 = vrot.slane %v90_v52, 4 }
 0x1fd   :  { %v92_v54 = vadd.f32 %v91_v53, %v90_v52 }
 0x1ff   :  { %v93_v55 = vrot.slane %v92_v54, 2 }
 0x201   :  { %v76_v56 = vpop.xlane.xlu1 %75  ;;  %v94_v59 = vadd.f32 %v93_v55, %v92_v54 }
 0x202   :  { %v77_v57 = vrot.slane %v76_v56, 4 }
 0x203   :  { %v95_v62 = vrot.slane %v94_v59, 1 }
 0x204   :  { %v78_v58 = vadd.f32 %v77_v57, %v76_v56 }
 0x205   :  { %v96_v1 = vadd.f32 %v95_v62, %v94_v59 }
 0x206   :  { %v79_v60 = vrot.slane %v78_v58, 2 }
 0x208   :  { %v80_v61 = vadd.f32 %v79_v60, %v78_v58 }
 0x20a   :  { %v81_v63 = vrot.slane %v80_v61, 1 }
 0x20c   :  { %v82_v0 = vadd.f32 %v81_v63, %v80_v61 }
 0x20e   :  { %115 = vpush %v82_v0 }
 0x20f   :  { %117 = vpush %v96_v1 }
 0x23f   :  { %s116_s0 = spop %115 }
 0x240   :  { %s118_s20 = spop %117 }
 0x241   :  { %s98_s21 = ssub.f32 %s116_s0, %s118_s20 }
 0x243   :  { %s99_s22 = smul.f32 0.625, %s98_s21 }
 0x245   :  { %101 = sst [smem:[#allocation2]] %s99_s22 }
 0x246   :  { %144 = shalt.err (!%p141_p2)
}
 0x247   :  { %s148_s30 = smov [#allocation2]  }
 0x248   :  { %109 = dma.smem_to_hbm %s148_s30, 16, %s205_s2, [#allocation3]  }
 0x249   :  { %145 = dma.done.wait [#allocation3], 16  }
 0x24a   :  { %146 = vsyncadd [#allocation3], 4294967280 }
 0x24b   :  { %113 = sfence }
 0x24c   :  { %114 = vsyncpa [#allocation3], 1 }

</bundles_post_ra>
